<compile_context>
chip_gen: v6e
topology: v6e:2x2x1
jax: 0.10.0
libtpu: 0.0.40
codegen_flags: <defaults>
</compile_context>

<pallas_src>
import jax
import jax.numpy as jnp
from jax import lax
from jax.experimental import pallas as pl
from jax.experimental.pallas import tpu as pltpu

DIM = 384
HIDDEN = 512
EPS = 1e-12


def lens_mlp_kernel(x_ref, w1_ref, b1_ref, w2_ref, o_ref):
    # x_ref:  (tm, DIM)      input dtype (f32)  -- ragged last tile is masked
    # w1_ref: (DIM, HIDDEN)  bf16  (resident: constant index_map)
    # b1_ref: (1, HIDDEN)    f32   (resident)
    # w2_ref: (HIDDEN, DIM)  bf16  (resident)
    # o_ref:  (tm, DIM)      out dtype (f32 by default)
    x = x_ref[...].astype(jnp.bfloat16)   # cast in-kernel: no extra HBM pass

    # Linear 1: bf16 operands on the MXU, f32 accumulation; bias + ReLU on VPU.
    h = jnp.dot(x, w1_ref[...], preferred_element_type=jnp.float32)
    h = jnp.maximum(h + b1_ref[...], 0.0)  # (tm,H) + (1,H) sublane broadcast

    # Linear 2 (no bias): recast h to bf16 for the MXU, accumulate in f32.
    y = jnp.dot(h.astype(jnp.bfloat16), w2_ref[...],
                preferred_element_type=jnp.float32)

    # L2 normalize: y / max(||y||, EPS) == y * rsqrt(max(||y||^2, EPS^2)).
    ssq = jnp.sum(y * y, axis=-1, keepdims=True)
    o_ref[...] = (y * lax.rsqrt(jnp.maximum(ssq, EPS * EPS))).astype(o_ref.dtype)


def _pick_tm(B):
    """Bucketed batch-tile selection (avoids per-B recompiles in serving)."""
    if B <= 128:
        return B            # single block == whole array; no masking needed
    if B >= 2048:
        return 1024         # amortize per-grid-step overhead on big batches
    for tm in (512, 256, 128):
        if pl.cdiv(B, tm) >= 2:   # >= 2 tiles so both v7x TCs get work
            return tm
    return 128


def lens_mlp(x, w1, b1, w2, *, out_dtype=None):
    """x: (B, DIM); w1: (DIM, HIDDEN); b1: (HIDDEN,); w2: (HIDDEN, DIM).

    Weights are stored pre-transposed (in_features, out_features) so the
    kernel computes plain x @ W (W1 = W1_pt.T, W2 = W2_pt.T).
    """
    B, D = x.shape
    assert D == DIM and w1.shape == (DIM, HIDDEN)
    assert b1.shape == (HIDDEN,) and w2.shape == (HIDDEN, DIM)
    out_dtype = x.dtype if out_dtype is None else out_dtype

    tm = _pick_tm(B)
    n_tiles = pl.cdiv(B, tm)

    # Small, resident operands only (no full-HBM pass over x / out here).
    w1_bf = w1.astype(jnp.bfloat16)
    w2_bf = w2.astype(jnp.bfloat16)
    b1_row = b1.astype(jnp.float32).reshape(1, HIDDEN)

    # Rough VMEM footprint (double-buffered x/out tiles, resident weights,
    # f32 intermediates).  Only override scoped VMEM when the tm=1024 case
    # threatens v5e's 16 MiB default; never lower any generation's default.
    est = (2 * tm * DIM * x.dtype.itemsize
           + 2 * tm * DIM * jnp.dtype(out_dtype).itemsize
           + 2 * 2 * (DIM * HIDDEN + HIDDEN * DIM)
           + 2 * 4 * HIDDEN
           + 4 * tm * (HIDDEN + DIM))
    vmem_limit = None
    if est > 8 * 1024 * 1024:
        vmem_limit = min(max(32 * 1024 * 1024, 2 * est), 48 * 1024 * 1024)

    return pl.pallas_call(
        lens_mlp_kernel,
        out_shape=jax.ShapeDtypeStruct((B, DIM), out_dtype),
        grid_spec=pltpu.PrefetchScalarGridSpec(
            num_scalar_prefetch=0,
            grid=(n_tiles,),
            in_specs=[
                pl.BlockSpec((tm, DIM), lambda i: (i, 0)),       # x tile
                pl.BlockSpec((DIM, HIDDEN), lambda i: (0, 0)),   # W1 (resident)
                pl.BlockSpec((1, HIDDEN), lambda i: (0, 0)),     # b1 row
                pl.BlockSpec((HIDDEN, DIM), lambda i: (0, 0)),   # W2 (resident)
            ],
            out_specs=pl.BlockSpec((tm, DIM), lambda i: (i, 0)),
        ),
        compiler_params=pltpu.CompilerParams(
            dimension_semantics=("parallel",),
            vmem_limit_bytes=vmem_limit,
        ),
    )(x, w1_bf, b1_row, w2_bf)


def reference(x, w1, b1, w2):
    h = jnp.maximum(x @ w1 + b1, 0.0)
    y = h @ w2
    n = jnp.maximum(jnp.linalg.norm(y, axis=-1, keepdims=True), EPS)
    return y / n


if __name__ == "__main__":
    key = jax.random.PRNGKey(0)
    kx, k1, kb, k2 = jax.random.split(key, 4)

    # Deterministic parameter init (mimicking nn.Linear's uniform fan-in init).
    bound1 = 1.0 / (DIM ** 0.5)
    bound2 = 1.0 / (HIDDEN ** 0.5)
    w1 = jax.random.uniform(k1, (DIM, HIDDEN), jnp.float32, -bound1, bound1)
    b1 = jax.random.uniform(kb, (HIDDEN,), jnp.float32, -bound1, bound1)
    w2 = jax.random.uniform(k2, (HIDDEN, DIM), jnp.float32, -bound2, bound2)

    # Two batch sizes: B=20 (single whole-array block) and B=300 (two tiles,
    # ragged last block with masked stores) to exercise both code paths.
    for B in (20, 300):
        x = jax.random.normal(jax.random.fold_in(kx, B), (B, DIM),
                              dtype=jnp.float32)
        out = jax.block_until_ready(lens_mlp(x, w1, b1, w2))
        ref = reference(x, w1, b1, w2)
        assert out.shape == ref.shape, f"shape mismatch vs reference (B={B})"
        # bf16 MXU operands (f32 accumulation) => ~1e-2 relative error vs f32.
        assert jnp.allclose(out, ref, atol=2e-2, rtol=2e-2), \
            f"mismatch vs reference (B={B})"
    print("KERNEL_OK")
</pallas_src>

<mosaic_0001>
module attributes {stable_mosaic.version = 11 : i64} {
  func.func @lens_mlp_kernel(%arg0: i32, %arg1: memref<20x384xf32, #tpu.memory_space<vmem>>, %arg2: memref<384x512xbf16, #tpu.memory_space<vmem>>, %arg3: memref<1x512xf32, #tpu.memory_space<vmem>>, %arg4: memref<512x384xbf16, #tpu.memory_space<vmem>>, %arg5: memref<20x384xf32, #tpu.memory_space<vmem>>) attributes {dimension_semantics = [#tpu.dimension_semantics<parallel>], iteration_bounds = array<i64: 1>, scalar_prefetch = 0 : i64, scratch_operands = 0 : i64, tpu.core_type = #tpu.core_type<tc>, window_params = [{transform_indices = @transform_0, window_bounds = array<i64: 20, 384>}, {pipeline_mode = #tpu.pipeline_mode<synchronous>, transform_indices = @transform_1, window_bounds = array<i64: 384, 512>}, {pipeline_mode = #tpu.pipeline_mode<synchronous>, transform_indices = @transform_2, window_bounds = array<i64: 1, 512>}, {pipeline_mode = #tpu.pipeline_mode<synchronous>, transform_indices = @transform_3, window_bounds = array<i64: 512, 384>}, {transform_indices = @transform_4, window_bounds = array<i64: 20, 384>}]} {
    %c0 = arith.constant 0 : index
    %c0_0 = arith.constant 0 : index
    %0 = vector.load %arg1[%c0, %c0_0] : memref<20x384xf32, #tpu.memory_space<vmem>>, vector<20x384xf32>
    %1 = arith.truncf %0 : vector<20x384xf32> to vector<20x384xbf16>
    %c0_1 = arith.constant 0 : index
    %c0_2 = arith.constant 0 : index
    %2 = vector.load %arg2[%c0_1, %c0_2] : memref<384x512xbf16, #tpu.memory_space<vmem>>, vector<384x512xbf16>
    %cst = arith.constant dense<0.000000e+00> : vector<20x512xf32>
    %3 = tpu.matmul %1, %2, %cst {dimension_numbers = #tpu.dot_dimension_numbers<[1], [0], [0], [1], [0, 0, 1, 1], [], []>} : vector<20x384xbf16>, vector<384x512xbf16>, vector<20x512xf32> -> vector<20x512xf32>
    %c0_3 = arith.constant 0 : index
    %c0_4 = arith.constant 0 : index
    %4 = vector.load %arg3[%c0_3, %c0_4] : memref<1x512xf32, #tpu.memory_space<vmem>>, vector<1x512xf32>
    %5 = vector.broadcast %4 : vector<1x512xf32> to vector<20x512xf32>
    %6 = arith.addf %3, %5 : vector<20x512xf32>
    %cst_5 = arith.constant 0.000000e+00 : f32
    %7 = vector.broadcast %cst_5 : f32 to vector<20x512xf32>
    %8 = arith.maximumf %6, %7 : vector<20x512xf32>
    %9 = arith.truncf %8 : vector<20x512xf32> to vector<20x512xbf16>
    %c0_6 = arith.constant 0 : index
    %c0_7 = arith.constant 0 : index
    %10 = vector.load %arg4[%c0_6, %c0_7] : memref<512x384xbf16, #tpu.memory_space<vmem>>, vector<512x384xbf16>
    %cst_8 = arith.constant dense<0.000000e+00> : vector<20x384xf32>
    %11 = tpu.matmul %9, %10, %cst_8 {dimension_numbers = #tpu.dot_dimension_numbers<[1], [0], [0], [1], [0, 0, 1, 1], [], []>} : vector<20x512xbf16>, vector<512x384xbf16>, vector<20x384xf32> -> vector<20x384xf32>
    %12 = arith.mulf %11, %11 : vector<20x384xf32>
    %cst_9 = arith.constant dense<0.000000e+00> : vector<20xf32>
    %13 = vector.multi_reduction <add>, %12, %cst_9 [1] : vector<20x384xf32> to vector<20xf32>
    %14 = vector.shape_cast %13 : vector<20xf32> to vector<20x1xf32>
    %cst_10 = arith.constant 1.000000e-24 : f32
    %15 = vector.broadcast %cst_10 : f32 to vector<20x1xf32>
    %16 = arith.maximumf %14, %15 : vector<20x1xf32>
    %17 = math.rsqrt %16 : vector<20x1xf32>
    %18 = vector.broadcast %17 : vector<20x1xf32> to vector<20x384xf32>
    %19 = arith.mulf %11, %18 : vector<20x384xf32>
    %c0_11 = arith.constant 0 : index
    %c0_12 = arith.constant 0 : index
    %20 = vector.load %arg5[%c0_11, %c0_12] : memref<20x384xf32, #tpu.memory_space<vmem>>, vector<20x384xf32>
    tpu.vector_store %arg5[%c0_11, %c0_12], %19 {strides = array<i32>} : memref<20x384xf32, #tpu.memory_space<vmem>>, vector<20x384xf32>,
    return
  }
  func.func @transform_0(%arg0: i32) -> (i32, i32) {
    %c0_i32 = arith.constant 0 : i32
    %c0_i32_0 = arith.constant 0 : i32
    return %arg0, %c0_i32 : i32, i32
  }
  func.func @transform_1(%arg0: i32) -> (i32, i32) {
    %c0_i32 = arith.constant 0 : i32
    %c0_i32_0 = arith.constant 0 : i32
    %c0_i32_1 = arith.constant 0 : i32
    return %c0_i32, %c0_i32_0 : i32, i32
  }
  func.func @transform_2(%arg0: i32) -> (i32, i32) {
    %c0_i32 = arith.constant 0 : i32
    %c0_i32_0 = arith.constant 0 : i32
    %c0_i32_1 = arith.constant 0 : i32
    return %c0_i32, %c0_i32_0 : i32, i32
  }
  func.func @transform_3(%arg0: i32) -> (i32, i32) {
    %c0_i32 = arith.constant 0 : i32
    %c0_i32_0 = arith.constant 0 : i32
    %c0_i32_1 = arith.constant 0 : i32
    return %c0_i32, %c0_i32_0 : i32, i32
  }
  func.func @transform_4(%arg0: i32) -> (i32, i32) {
    %c0_i32 = arith.constant 0 : i32
    %c0_i32_0 = arith.constant 0 : i32
    return %arg0, %c0_i32 : i32, i32
  }
}

</mosaic_0001>

<bundles_post_ra>
// kernel: tpu_custom_call.1
= control target key start
LH: loop header
LB: loop body
LE: loop exit
PB: predicated region body
PF: predicated region fallthrough
CT: control target
= control target key end

     0   :  { %9 = vsyncpa [#allocation3], 0  ;;  %s2561_s0 = inlined_call_operand.hbm [shape: f32[20,384], index: 0, kind: input, shape index: {}]   ;;  %s2562_s1 = inlined_call_operand.hbm [shape: bf16[384,512], index: 1, kind: input, shape index: {}]   ;;  %s2563_s2 = inlined_call_operand.hbm [shape: f32[1,512], index: 2, kind: input, shape index: {}]   ;;  %s2564_s3 = inlined_call_operand.hbm [shape: bf16[512,384], index: 3, kind: input, shape index: {}]   ;;  %s2565_s4 = inlined_call_operand.hbm [shape: f32[20,384], index: 4, kind: output, shape index: {}]  }
   0x1   :  { %10 = vsyncpa [#allocation6], 0 }
   0x2   :  { %11 = vsyncpa [#allocation9], 0 }
   0x3   :  { %12 = vsyncpa [#allocation4], 0  ;;  %s2461_s15 = smov [#allocation5]  }
   0x4   :  { %s30_s16 = sshll.u32 %s2461_s15, 4  ;;  %s31_s16 = int_to_ptr.vmem [resolvable:$true] %s30_s16 }
   0x5   :  { %s2361_s17 = scalar_lea.vmem %s31_s16, 12288  ;;  %p2366_p1 = scmp.lt.s32.totalorder %s31_s16, %s31_s16 }
   0x6   :  { %p2362_p0 = scmp.ne.s32.totalorder %s31_s16, %s2361_s17  ;;  %p2367_p2 = scmp.lt.s32.totalorder %s2361_s17, %s2361_s17 }
   0x8   :  { %p2368_p3 = por %p2367_p2, %p2366_p1 }
   0xa   :  { %p2369_p4 = pnand %p2368_p3, %p2362_p0 }
   0xc   :  { %2372 = shalt.err (!%p2369_p4)
}
   0xd   :  { %s2462_s18 = smov 256   ;;  %s2463_s19 = smov 16  }
   0xe   :  { %36 = dma.hbm_to_vmem [thread:$0]  %s2562_s1, 12288, %s31_s16, [#allocation6], %s2462_s18, %s2462_s18, %s2463_s19  }
   0xf   :  { %s2464_s22 = smov [#allocation2]  }
  0x10   :  { %s18_s23 = sshll.u32 %s2464_s22, 4  ;;  %s19_s23 = int_to_ptr.vmem [resolvable:$true] %s18_s23 }
  0x11   :  { %s2381_s24 = scalar_lea.vmem %s19_s23, 1152  ;;  %p2386_p6 = scmp.lt.s32.totalorder %s19_s23, %s19_s23 }
  0x12   :  { %p2382_p5 = scmp.ne.s32.totalorder %s19_s23, %s2381_s24  ;;  %p2387_p7 = scmp.lt.s32.totalorder %s2381_s24, %s2381_s24 }
  0x14   :  { %p2388_p8 = por %p2387_p7, %p2386_p6 }
  0x16   :  { %p2389_p9 = pnand %p2388_p8, %p2382_p5 }
  0x18   :  { %2392 = shalt.err (!%p2389_p9)
}
  0x19   :  { %s2465_s25 = smov 384   ;;  %s2466_s26 = smov 24  }
  0x1a   :  { %24 = dma.hbm_to_vmem [thread:$0]  %s2561_s0, 1152, %s19_s23, [#allocation3], %s2465_s25, %s2465_s25, %s2466_s26  }
  0x1b   :  { %s2467_s1 = smov [#allocation7]   ;;  %s2468_s30 = smov [#allocation8]  }
  0x1c   :  { %s43_s29 = sshll.u32 %s2467_s1, 4  ;;  %s52_s5 = sshll.u32 %s2468_s30, 4  ;;  %s44_s29 = int_to_ptr.vmem [resolvable:$true] %s43_s29  ;;  %s53_s5 = int_to_ptr.vmem [resolvable:$true] %s52_s5 }
  0x1d   :  { %s2401_s6 = scalar_lea.vmem %s44_s29, 64  ;;  %p2406_p11 = scmp.lt.s32.totalorder %s44_s29, %s44_s29 }
  0x1e   :  { %p2402_p10 = scmp.ne.s32.totalorder %s44_s29, %s2401_s6  ;;  %p2407_p12 = scmp.lt.s32.totalorder %s2401_s6, %s2401_s6 }
  0x20   :  { %p2408_p13 = por %p2407_p12, %p2406_p11 }
  0x22   :  { %p2409_p0 = pnand %p2408_p13, %p2402_p10 }
  0x24   :  { %2412 = shalt.err (!%p2409_p0)
}
  0x25   :  { %46 = dma.hbm_to_vmem [thread:$0]  %s2563_s2, 64, %s44_s29, [#allocation6]  }
  0x26   :  { %s2421_s9 = scalar_lea.vmem %s53_s5, 12288  ;;  %p2426_p2 = scmp.lt.s32.totalorder %s53_s5, %s53_s5 }
  0x27   :  { %p2422_p1 = scmp.ne.s32.totalorder %s53_s5, %s2421_s9  ;;  %p2427_p3 = scmp.lt.s32.totalorder %s2421_s9, %s2421_s9 }
  0x29   :  { %p2428_p4 = por %p2427_p3, %p2426_p2 }
  0x2b   :  { %p2429_p5 = pnand %p2428_p4, %p2422_p1 }
  0x2d   :  { %2432 = shalt.err (!%p2429_p5)
}
  0x2e   :  { %s2469_s0 = smov 192   ;;  %s2470_s10 = smov 12  }
  0x2f   :  { %58 = dma.hbm_to_vmem [thread:$0]  %s2564_s3, 12288, %s53_s5, [#allocation9], %s2469_s0, %s2469_s0, %s2470_s10  }
  0x30   :  { %2453 = dma.done.wait [#allocation3], 1152  }
  0x31   :  { %2454 = vsyncadd [#allocation3], 4294966144 }
  0x32   :  { %2455 = dma.done.wait [#allocation6], 12352  }
  0x33   :  { %2456 = vsyncadd [#allocation6], 4294954944 }
  0x34   :  { %2457 = dma.done.wait [#allocation9], 12288  }
  0x35   :  { %2458 = vsyncadd [#allocation9], 4294955008  ;;  %v2471_v0 = vmov 0   ;;  %v2075_v1 = vld [vmem:[#allocation5 + $0xe4] ss:$16 sps:$4 sm:$0xff]   ;;  %v74_v33 = vld [vmem:[#allocation2 + $0x10] sm:$0xff] }
  0x36   :  { %768 = vmatprep.mubr.bf16.mxu1 %v2471_v0  ;;  %v2077_v2 = vld [vmem:[#allocation5 + $0x2e4] ss:$16 sps:$4 sm:$0xff]   ;;  %685 = vmatprep.subr.bf16.mxu0 %v2075_v1  ;;  %v2079_v3 = vld [vmem:[#allocation5 + $0xe0] ss:$16 sps:$4 sm:$0xff]   ;;  %v2127_v36 = vld [vmem:[#allocation5 + $0xec] ss:$16 sps:$4 sm:$0xff]  }
  0x37   :  { %v2080_v4 = vld [vmem:[#allocation5 + $0x2e0] ss:$16 sps:$4 sm:$0xff]   ;;  %736 = vmatprep.subr.bf16.mxu1 %v2077_v2  ;;  %v2081_v5 = vld [vmem:[#allocation5 + $0xc4] ss:$16 sps:$4 sm:$0xff]   ;;  %686 = vmatpush1.bf16.msra.mxu0 %v2079_v3  ;;  %v2125_v38 = vld [vmem:[#allocation5 + $0xe8] ss:$16 sps:$4 sm:$0xff]  }
  0x38   :  { %737 = vmatpush1.bf16.msra.mxu1 %v2080_v4  ;;  %v2083_v6 = vld [vmem:[#allocation5 + $0x2c4] ss:$16 sps:$4 sm:$0xff]   ;;  %v2085_v7 = vld [vmem:[#allocation5 + $0xc0] ss:$16 sps:$4 sm:$0xff]   ;;  %687 = vmatprep.subr.bf16.mxu0 %v2081_v5  ;;  %v2133_v41 = vld [vmem:[#allocation5 + $0xcc] ss:$16 sps:$4 sm:$0xff]  }
  0x39   :  { %v2086_v8 = vld [vmem:[#allocation5 + $0x2c0] ss:$16 sps:$4 sm:$0xff]   ;;  %738 = vmatprep.subr.bf16.mxu1 %v2083_v6  ;;  %v2087_v9 = vld [vmem:[#allocation5 + $0xa4] ss:$16 sps:$4 sm:$0xff]   ;;  %v2131_v42 = vld [vmem:[#allocation5 + $0xc8] ss:$16 sps:$4 sm:$0xff]  }
  0x3a   :  { %v2089_v10 = vld [vmem:[#allocation5 + $0x2a4] ss:$16 sps:$4 sm:$0xff]   ;;  %v2091_v11 = vld [vmem:[#allocation5 + $0xa0] ss:$16 sps:$4 sm:$0xff]   ;;  %v2139_v45 = vld [vmem:[#allocation5 + $0xac] ss:$16 sps:$4 sm:$0xff]  }
  0x3b   :  { %v2092_v12 = vld [vmem:[#allocation5 + $0x2a0] ss:$16 sps:$4 sm:$0xff]   ;;  %688 = vmatpush1.bf16.msra.mxu0 %v2085_v7  ;;  %v2093_v13 = vld [vmem:[#allocation5 + $0x84] ss:$16 sps:$4 sm:$0xff]   ;;  %v2137_v46 = vld [vmem:[#allocation5 + $0xa8] ss:$16 sps:$4 sm:$0xff]  }
  0x3c   :  { %739 = vmatpush1.bf16.msra.mxu1 %v2086_v8  ;;  %689 = vmatprep.subr.bf16.mxu0 %v2087_v9  ;;  %v2095_v14 = vld [vmem:[#allocation5 + $0x284] ss:$16 sps:$4 sm:$0xff]   ;;  %v2097_v15 = vld [vmem:[#allocation5 + $0x80] ss:$16 sps:$4 sm:$0xff]   ;;  %v2145_v49 = vld [vmem:[#allocation5 + $0x8c] ss:$16 sps:$4 sm:$0xff]  }
  0x3d   :  { %740 = vmatprep.subr.bf16.mxu1 %v2089_v10  ;;  %v2098_v16 = vld [vmem:[#allocation5 + $0x280] ss:$16 sps:$4 sm:$0xff]   ;;  %v2099_v17 = vld [vmem:[#allocation5 + $0x64] ss:$16 sps:$4 sm:$0xff]   ;;  %v76_v51 = vld [vmem:[#allocation2 + $0x20] sm:$0xff]  ;;  %vm1764_vm0 = vcmask 1043456  }
  0x3e   :  { %v2101_v18 = vld [vmem:[#allocation5 + $0x264] ss:$16 sps:$4 sm:$0xff]   ;;  %v2103_v19 = vld [vmem:[#allocation5 + $0x60] ss:$16 sps:$4 sm:$0xff]   ;;  %v2143_v52 = vld [vmem:[#allocation5 + $0x88] ss:$16 sps:$4 sm:$0xff]  }
  0x3f   :  { %690 = vmatpush1.bf16.msra.mxu0 %v2091_v11  ;;  %v2104_v20 = vld [vmem:[#allocation5 + $0x260] ss:$16 sps:$4 sm:$0xff]   ;;  %v2105_v21 = vld [vmem:[#allocation5 + $0x44] ss:$16 sps:$4 sm:$0xff]   ;;  %v2151_v56 = vld [vmem:[#allocation5 + $0x6c] ss:$16 sps:$4 sm:$0xff]  }
  0x40   :  { %741 = vmatpush1.bf16.msra.mxu1 %v2092_v12  ;;  %691 = vmatprep.subr.bf16.mxu0 %v2093_v13  ;;  %v2107_v22 = vld [vmem:[#allocation5 + $0x244] ss:$16 sps:$4 sm:$0xff]   ;;  %v2109_v23 = vld [vmem:[#allocation5 + $0x40] ss:$16 sps:$4 sm:$0xff]   ;;  %v2149_v57 = vld [vmem:[#allocation5 + $0x68] ss:$16 sps:$4 sm:$0xff]  }
  0x41   :  { %742 = vmatprep.subr.bf16.mxu1 %v2095_v14  ;;  %v2110_v24 = vld [vmem:[#allocation5 + $0x240] ss:$16 sps:$4 sm:$0xff]   ;;  %v2111_v25 = vld [vmem:[#allocation5 + $0x24] ss:$16 sps:$4 sm:$0xff]   ;;  %v2157_v60 = vld [vmem:[#allocation5 + $0x4c] ss:$16 sps:$4 sm:$0xff]  }
  0x42   :  { %v2113_v26 = vld [vmem:[#allocation5 + $0x224] ss:$16 sps:$4 sm:$0xff]   ;;  %v2115_v27 = vld [vmem:[#allocation5 + $0x20] ss:$16 sps:$4 sm:$0xff]   ;;  %v2155_v61 = vld [vmem:[#allocation5 + $0x48] ss:$16 sps:$4 sm:$0xff]  }
  0x43   :  { %692 = vmatpush1.bf16.msra.mxu0 %v2097_v15  ;;  %v2116_v28 = vld [vmem:[#allocation5 + $0x220] ss:$16 sps:$4 sm:$0xff]   ;;  %v2117_v29 = vld [vmem:[#allocation5 + $0x4] ss:$16 sps:$4 sm:$0xff]   ;;  %v2163_v1 = vld [vmem:[#allocation5 + $0x2c] ss:$16 sps:$4 sm:$0xff]  }
  0x44   :  { %743 = vmatpush1.bf16.msra.mxu1 %v2098_v16  ;;  %693 = vmatprep.subr.bf16.mxu0 %v2099_v17  ;;  %v2119_v30 = vld [vmem:[#allocation5 + $0x204] ss:$16 sps:$4 sm:$0xff]   ;;  %v2121_v31 = vld [vmem:[#allocation5] ss:$16 sps:$4 sm:$0xff]   ;;  %v2161_v2 = vld [vmem:[#allocation5 + $0x28] ss:$16 sps:$4 sm:$0xff]  }
  0x45   :  { %744 = vmatprep.subr.bf16.mxu1 %v2101_v18  ;;  %v2122_v32 = vld [vmem:[#allocation5 + $0x200] ss:$16 sps:$4 sm:$0xff]   ;;  %v2123_v35 = vld [vmem:[#allocation5 + $0x1e4] ss:$16 sps:$4 sm:$0xff]   ;;  %v80_v4 = vld [vmem:[#allocation2 + $0x40] sm:$0xf] }
  0x46   :  { %v77_v34 = vld [vmem:[#allocation2 + $0x28] sm:$0xff]  ;;  %v2169_v6 = vld [vmem:[#allocation5 + $0xc] ss:$16 sps:$4 sm:$0xff]   ;;  %v2518_v7 = vpack.c.bf16 %v80_v4, %v80_v4  ;;  %v2167_v8 = vld [vmem:[#allocation5 + $0x8] ss:$16 sps:$4 sm:$0xff]   ;;  %s2472_s2 = smov [#allocation10]  }
  0x47   :  { %694 = vmatpush1.bf16.msra.mxu0 %v2103_v19  ;;  %v2514_v37 = vpack.c.bf16 %v77_v34, %v74_v33  ;;  %v2128_v39 = vld [vmem:[#allocation5 + $0x1e0] ss:$16 sps:$4 sm:$0xff]   ;;  %v2129_v40 = vld [vmem:[#allocation5 + $0x1c4] ss:$16 sps:$4 sm:$0xff]   ;;  %v72_v10 = vld [vmem:[#allocation2] sm:$0xff]  ;;  %s1801_s3 = sshll.u32 %s2472_s2, 4  ;;  %s1802_s3 = int_to_ptr.vmem [resolvable:$true] %s1801_s3 }
  0x48   :  { %745 = vmatpush1.bf16.msra.mxu1 %v2104_v20  ;;  %695 = vmatprep.subr.bf16.mxu0 %v2105_v21  ;;  %v2134_v43 = vld [vmem:[#allocation5 + $0x1c0] ss:$16 sps:$4 sm:$0xff]   ;;  %v2135_v44 = vld [vmem:[#allocation5 + $0x1a4] ss:$16 sps:$4 sm:$0xff]   ;;  %v2173_v12 = vld [vmem:[#allocation5 + $0x1ec] ss:$16 sps:$4 sm:$0xff]   ;;  %p2438_p7 = scmp.lt.s32.totalorder %s1802_s3, %s1802_s3 }
  0x49   :  { %746 = vmatprep.subr.bf16.mxu1 %v2107_v22  ;;  %v2140_v47 = vld [vmem:[#allocation5 + $0x1a0] ss:$16 sps:$4 sm:$0xff]   ;;  %v2141_v48 = vld [vmem:[#allocation5 + $0x184] ss:$16 sps:$4 sm:$0xff]   ;;  %v2176_v13 = vld [vmem:[#allocation5 + $0x2ec] ss:$16 sps:$4 sm:$0xff]  }
  0x4a   :  { %v73_v50 = vld [vmem:[#allocation2 + $0x8] sm:$0xff]  ;;  %v75_v11 = vld [vmem:[#allocation2 + $0x18] sm:$0xff]  ;;  %v2171_v14 = vld [vmem:[#allocation5 + $0x1e8] ss:$16 sps:$4 sm:$0xff]   ;;  %s2433_s13 = scalar_lea.vmem %s1802_s3, 1152 }
  0x4b   :  { %696 = vmatpush1.bf16.msra.mxu0 %v2109_v23  ;;  %v2146_v53 = vld [vmem:[#allocation5 + $0x180] ss:$16 sps:$4 sm:$0xff]   ;;  %v82_v54 = vpack.c.bf16 %v76_v51, %v73_v50  ;;  %v2147_v55 = vld [vmem:[#allocation5 + $0x164] ss:$16 sps:$4 sm:$0xff]   ;;  %v2521_v15 = vpack.c.bf16 %v75_v11, %v72_v10  ;;  %v2174_v17 = vld [vmem:[#allocation5 + $0x2e8] ss:$16 sps:$4 sm:$0xff]   ;;  %p2434_p6 = scmp.ne.s32.totalorder %s1802_s3, %s2433_s13  ;;  %p2439_p8 = scmp.lt.s32.totalorder %s2433_s13, %s2433_s13 }
  0x4c   :  { %747 = vmatpush1.bf16.msra.mxu1 %v2110_v24  ;;  %697 = vmatprep.subr.bf16.mxu0 %v2111_v25  ;;  %v2152_v58 = vld [vmem:[#allocation5 + $0x160] ss:$16 sps:$4 sm:$0xff]   ;;  %v2153_v59 = vld [vmem:[#allocation5 + $0x144] ss:$16 sps:$4 sm:$0xff]   ;;  %v2179_v18 = vld [vmem:[#allocation5 + $0x1cc] ss:$16 sps:$4 sm:$0xff]  }
  0x4d   :  { %748 = vmatprep.subr.bf16.mxu1 %v2113_v26  ;;  %717 = vmatprep.mubr.bf16.mxu0 %v82_v54  ;;  %v2158_v62 = vld [vmem:[#allocation5 + $0x140] ss:$16 sps:$4 sm:$0xff]   ;;  %v2159_v63 = vld [vmem:[#allocation5 + $0x124] ss:$16 sps:$4 sm:$0xff]   ;;  %v2182_v19 = vld [vmem:[#allocation5 + $0x2cc] ss:$16 sps:$4 sm:$0xff]   ;;  %p2440_p9 = por %p2439_p8, %p2438_p7 }
  0x4e   :  { %v2164_v3 = vld [vmem:[#allocation5 + $0x120] ss:$16 sps:$4 sm:$0xff]   ;;  %v2165_v5 = vld [vmem:[#allocation5 + $0x104] ss:$16 sps:$4 sm:$0xff]   ;;  %v2177_v20 = vld [vmem:[#allocation5 + $0x1c8] ss:$16 sps:$4 sm:$0xff]  }
  0x4f   :  { %698 = vmatpush1.bf16.msra.mxu0 %v2115_v27  ;;  %v2170_v9 = vld [vmem:[#allocation5 + $0x100] ss:$16 sps:$4 sm:$0xff]   ;;  %v2180_v22 = vld [vmem:[#allocation5 + $0x2c8] ss:$16 sps:$4 sm:$0xff]   ;;  %v2185_v24 = vld [vmem:[#allocation5 + $0x1ac] ss:$16 sps:$4 sm:$0xff]   ;;  %p2441_p10 = pnand %p2440_p9, %p2434_p6 }
  0x50   :  { %749 = vmatpush1.bf16.msra.mxu1 %v2116_v28  ;;  %699 = vmatprep.subr.bf16.mxu0 %v2117_v29  ;;  %v79_v16 = vld [vmem:[#allocation2 + $0x38] sm:$0xf]  ;;  %v78_v23 = vld [vmem:[#allocation2 + $0x30] sm:$0xf]  ;;  %v2188_v25 = vld [vmem:[#allocation5 + $0x2ac] ss:$16 sps:$4 sm:$0xff]  }
  0x51   :  { %750 = vmatprep.subr.bf16.mxu1 %v2119_v30  ;;  %v2523_v21 = vpack.c.bf16 %v79_v16, %v79_v16  ;;  %v2183_v26 = vld [vmem:[#allocation5 + $0x1a8] ss:$16 sps:$4 sm:$0xff]   ;;  %v2527_v27 = vpack.c.bf16 %v78_v23, %v78_v23  ;;  %v2191_v29 = vld [vmem:[#allocation5 + $0x18c] ss:$16 sps:$4 sm:$0xff]   ;;  %v2240_v10 = vld [vmem:[#allocation8] ss:$12 sps:$4 sm:$0xff]  }
  0x52   :  { %v2186_v28 = vld [vmem:[#allocation5 + $0x2a8] ss:$16 sps:$4 sm:$0xff]   ;;  %v2194_v30 = vld [vmem:[#allocation5 + $0x28c] ss:$16 sps:$4 sm:$0xff]   ;;  %v2276_v16 = vld [vmem:[#allocation8 + $0x1b0] ss:$12 sps:$4 sm:$0xff]  }
  0x53   :  { %700 = vmatpush1.bf16.msra.mxu0 %v2121_v31  ;;  %v2189_v31 = vld [vmem:[#allocation5 + $0x188] ss:$16 sps:$4 sm:$0xff]   ;;  %v2197_v33 = vld [vmem:[#allocation5 + $0x16c] ss:$16 sps:$4 sm:$0xff]   ;;  %v2261_v23 = vld [vmem:[#allocation8 + $0x120] ss:$12 sps:$4 sm:$0xff]  }
  0x54   :  { %751 = vmatpush1.bf16.msra.mxu1 %v2122_v32  ;;  %701 = vmatprep.subr.bf16.mxu0 %v2123_v35  ;;  %v2192_v32 = vld [vmem:[#allocation5 + $0x288] ss:$16 sps:$4 sm:$0xff]   ;;  %v2200_v34 = vld [vmem:[#allocation5 + $0x26c] ss:$16 sps:$4 sm:$0xff]  }
  0x55   :  { %787 = vmatprep.subr.bf16.mxu1 %v2127_v36  ;;  %v2195_v35 = vld [vmem:[#allocation5 + $0x168] ss:$16 sps:$4 sm:$0xff]   ;;  %v2221_v50 = vld [vmem:[#allocation8 + $0xac] ss:$12 sps:$4 sm:$0xff]   ;;  %v2239_v4 = vld [vmem:[#allocation8 + $0x1c] ss:$12 sps:$4 sm:$0xff]  }
  0x56   :  { %v2198_v36 = vld [vmem:[#allocation5 + $0x268] ss:$16 sps:$4 sm:$0xff]   ;;  %v2245_v11 = vld [vmem:[#allocation8 + $0x16c] ss:$12 sps:$4 sm:$0xff]  }
  0x57   :  { %769 = vmatmul.mubr.bf16.vlgmr.msra.gmra.mxu1 %v2514_v37  ;;  %702 = vmatpush2.bf16.msra.mxu0 %v2128_v39  ;;  %v2206_v39 = vld [vmem:[#allocation5 + $0x24c] ss:$16 sps:$4 sm:$0xff]  }
  0x58   :  { %788 = vmatpush1.bf16.msra.mxu1 %v2125_v38  ;;  %703 = vmatprep.subr.bf16.mxu0 %v2129_v40  ;;  %v2203_v38 = vld [vmem:[#allocation5 + $0x14c] ss:$16 sps:$4 sm:$0xff]   ;;  %v2201_v40 = vld [vmem:[#allocation5 + $0x148] ss:$16 sps:$4 sm:$0xff]  }
  0x59   :  { %789 = vmatprep.subr.bf16.mxu1 %v2133_v41  ;;  %778 = vmatprep.mubr.bf16.mxu1 %v2471_v0  ;;  %v2204_v41 = vld [vmem:[#allocation5 + $0x248] ss:$16 sps:$4 sm:$0xff]  }
  0x5a   :  { %v2219_v51 = vld [vmem:[#allocation8 + $0xa8] ss:$12 sps:$4 sm:$0xff]  }
  0x5b   :  { %704 = vmatpush2.bf16.msra.mxu0 %v2134_v43  ;;  %v2212_v43 = vld [vmem:[#allocation5 + $0x22c] ss:$16 sps:$4 sm:$0xff]  }
  0x5c   :  { %790 = vmatpush1.bf16.msra.mxu1 %v2131_v42  ;;  %705 = vmatprep.subr.bf16.mxu0 %v2135_v44  ;;  %v2209_v42 = vld [vmem:[#allocation5 + $0x12c] ss:$16 sps:$4 sm:$0xff]   ;;  %v2207_v44 = vld [vmem:[#allocation5 + $0x128] ss:$16 sps:$4 sm:$0xff]  }
  0x5d   :  { %791 = vmatprep.subr.bf16.mxu1 %v2139_v45  ;;  %v2210_v45 = vld [vmem:[#allocation5 + $0x228] ss:$16 sps:$4 sm:$0xff]  }
  0x5f   :  { %706 = vmatpush2.bf16.msra.mxu0 %v2140_v47  ;;  %779 = vmatmul.mubr.bf16.gmra.mxu1 %v2518_v7  ;;  %v2218_v47 = vld [vmem:[#allocation5 + $0x20c] ss:$16 sps:$4 sm:$0xff]  }
  0x60   :  { %792 = vmatpush1.bf16.msra.mxu1 %v2137_v46  ;;  %707 = vmatprep.subr.bf16.mxu0 %v2141_v48  ;;  %v2215_v46 = vld [vmem:[#allocation5 + $0x10c] ss:$16 sps:$4 sm:$0xff]   ;;  %v2213_v48 = vld [vmem:[#allocation5 + $0x108] ss:$16 sps:$4 sm:$0xff]  }
  0x61   :  { %793 = vmatprep.subr.bf16.mxu1 %v2145_v49  ;;  %819 = vmatprep.mubr.bf16.mxu1 %v82_v54  ;;  %v2216_v49 = vld [vmem:[#allocation5 + $0x208] ss:$16 sps:$4 sm:$0xff]   ;;  %v2227_v54 = vld [vmem:[#allocation8 + $0x7c] ss:$12 sps:$4 sm:$0xff]  }
  0x63   :  { %708 = vmatpush2.bf16.msra.mxu0 %v2146_v53  ;;  %v2222_v53 = vld [vmem:[#allocation8 + $0x90] ss:$12 sps:$4 sm:$0xff]  }
  0x64   :  { %794 = vmatpush1.bf16.msra.mxu1 %v2143_v52  ;;  %709 = vmatprep.subr.bf16.mxu0 %v2147_v55  ;;  %v2224_v52 = vld [vmem:[#allocation8 + $0x94] ss:$12 sps:$4 sm:$0xff]   ;;  %v2225_v55 = vld [vmem:[#allocation8 + $0x78] ss:$12 sps:$4 sm:$0xff]  }
  0x65   :  { %795 = vmatprep.subr.bf16.mxu1 %v2151_v56  ;;  %v2230_v56 = vld [vmem:[#allocation8 + $0x64] ss:$12 sps:$4 sm:$0xff]  }
  0x67   :  { %710 = vmatpush2.bf16.msra.mxu0 %v2152_v58  ;;  %v2248_v58 = vld [vmem:[#allocation8 + $0x22c] ss:$12 sps:$4 sm:$0xff]  }
  0x68   :  { %796 = vmatpush1.bf16.msra.mxu1 %v2149_v57  ;;  %711 = vmatprep.subr.bf16.mxu0 %v2153_v59  ;;  %v2246_v57 = vld [vmem:[#allocation8 + $0x228] ss:$12 sps:$4 sm:$0xff]  }
  0x69   :  { %797 = vmatprep.subr.bf16.mxu1 %v2157_v60  ;;  %v2254_v59 = vld [vmem:[#allocation8 + $0x214] ss:$12 sps:$4 sm:$0xff]   ;;  %v2252_v60 = vld [vmem:[#allocation8 + $0x210] ss:$12 sps:$4 sm:$0xff]  }
  0x6b   :  { %712 = vmatpush2.bf16.msra.mxu0 %v2158_v62  ;;  %v2231_v62 = vld [vmem:[#allocation8 + $0x48] ss:$12 sps:$4 sm:$0xff]  }
  0x6c   :  { %798 = vmatpush1.bf16.msra.mxu1 %v2155_v61  ;;  %713 = vmatprep.subr.bf16.mxu0 %v2159_v63  ;;  %v2260_v61 = vld [vmem:[#allocation8 + $0x1fc] ss:$12 sps:$4 sm:$0xff]   ;;  %v2236_v63 = vld [vmem:[#allocation8 + $0x34] ss:$12 sps:$4 sm:$0xff]  }
  0x6d   :  { %799 = vmatprep.subr.bf16.mxu1 %v2163_v1  ;;  %v2258_v1 = vld [vmem:[#allocation8 + $0x1f8] ss:$12 sps:$4 sm:$0xff]  }
  0x6f   :  { %714 = vmatpush2.bf16.msra.mxu0 %v2164_v3  ;;  %v2266_v3 = vld [vmem:[#allocation8 + $0x1e4] ss:$12 sps:$4 sm:$0xff]  }
  0x70   :  { %800 = vmatpush1.bf16.msra.mxu1 %v2161_v2  ;;  %715 = vmatprep.subr.bf16.mxu0 %v2165_v5  ;;  %v2234_v2 = vld [vmem:[#allocation8 + $0x30] ss:$12 sps:$4 sm:$0xff]   ;;  %v2264_v5 = vld [vmem:[#allocation8 + $0x1e0] ss:$12 sps:$4 sm:$0xff]  }
  0x71   :  { %801 = vmatprep.subr.bf16.mxu1 %v2169_v6  ;;  %v2272_v6 = vld [vmem:[#allocation8 + $0x1cc] ss:$12 sps:$4 sm:$0xff]  }
  0x73   :  { %716 = vmatpush2.bf16.msra.mxu0 %v2170_v9  ;;  %v2270_v9 = vld [vmem:[#allocation8 + $0x1c8] ss:$12 sps:$4 sm:$0xff]  }
  0x74   :  { %802 = vmatpush1.bf16.msra.mxu1 %v2167_v8  ;;  %838 = vmatprep.subr.bf16.mxu0 %v2176_v13  ;;  %v2242_v8 = vld [vmem:[#allocation8 + $0x4] ss:$12 sps:$4 sm:$0xff]   ;;  %v2251_v13 = vld [vmem:[#allocation8 + $0x154] ss:$12 sps:$4 sm:$0xff]  }
  0x75   :  { %803 = vmatprep.subr.bf16.mxu1 %v2173_v12  ;;  %v2243_v12 = vld [vmem:[#allocation8 + $0x168] ss:$12 sps:$4 sm:$0xff]  }
  0x76   :  { %718 = vmatmul.mubr.bf16.vlgmr.msra.gmra.mxu0 %v2521_v15 }
  0x77   :  { %839 = vmatpush1.bf16.msra.mxu0 %v2174_v17  ;;  %727 = vmatprep.mubr.bf16.mxu0 %v2523_v21  ;;  %v2257_v17 = vld [vmem:[#allocation8 + $0x13c] ss:$12 sps:$4 sm:$0xff]  }
  0x78   :  { %804 = vmatpush2.bf16.msra.mxu1 %v2171_v14  ;;  %840 = vmatprep.subr.bf16.mxu0 %v2182_v19  ;;  %v2278_v14 = vld [vmem:[#allocation8 + $0x1b4] ss:$12 sps:$4 sm:$0xff]   ;;  %v2255_v19 = vld [vmem:[#allocation8 + $0x138] ss:$12 sps:$4 sm:$0xff]  }
  0x79   :  { %805 = vmatprep.subr.bf16.mxu1 %v2179_v18  ;;  %v2284_v18 = vld [vmem:[#allocation8 + $0x19c] ss:$12 sps:$4 sm:$0xff]  }
  0x7b   :  { %841 = vmatpush1.bf16.msra.mxu0 %v2180_v22  ;;  %v2290_v22 = vld [vmem:[#allocation8 + $0x184] ss:$12 sps:$4 sm:$0xff]  }
  0x7c   :  { %806 = vmatpush2.bf16.msra.mxu1 %v2177_v20  ;;  %842 = vmatprep.subr.bf16.mxu0 %v2188_v25  ;;  %v2282_v20 = vld [vmem:[#allocation8 + $0x198] ss:$12 sps:$4 sm:$0xff]  }
  0x7d   :  { %807 = vmatprep.subr.bf16.mxu1 %v2185_v24  ;;  %v2288_v24 = vld [vmem:[#allocation8 + $0x180] ss:$12 sps:$4 sm:$0xff]  }
  0x7e   :  { %728 = vmatmul.mubr.bf16.gmra.mxu0 %v2527_v27  ;;  %v2269_v25 = vld [vmem:[#allocation8 + $0x10c] ss:$12 sps:$4 sm:$0xff]  }
  0x7f   :  { %843 = vmatpush1.bf16.msra.mxu0 %v2186_v28  ;;  %870 = vmatprep.mubr.bf16.mxu0 %v2471_v0  ;;  %v2291_v28 = vld [vmem:[#allocation8 + $0x2e8] ss:$12 sps:$4 sm:$0xff]  }
  0x80   :  { %808 = vmatpush2.bf16.msra.mxu1 %v2183_v26  ;;  %844 = vmatprep.subr.bf16.mxu0 %v2194_v30  ;;  %v2293_v26 = vld [vmem:[#allocation8 + $0x2ec] ss:$12 sps:$4 sm:$0xff]   ;;  %v2296_v30 = vld [vmem:[#allocation8 + $0x2d0] ss:$12 sps:$4 sm:$0xff]  }
  0x81   :  { %809 = vmatprep.subr.bf16.mxu1 %v2191_v29  ;;  %v2275_v29 = vld [vmem:[#allocation8 + $0xf4] ss:$12 sps:$4 sm:$0xff]  }
  0x83   :  { %845 = vmatpush1.bf16.msra.mxu0 %v2192_v32  ;;  %v2273_v32 = vld [vmem:[#allocation8 + $0xf0] ss:$12 sps:$4 sm:$0xff]  }
  0x84   :  { %810 = vmatpush2.bf16.msra.mxu1 %v2189_v31  ;;  %846 = vmatprep.subr.bf16.mxu0 %v2200_v34  ;;  %v2298_v31 = vld [vmem:[#allocation8 + $0x2d4] ss:$12 sps:$4 sm:$0xff]   ;;  %v2301_v34 = vld [vmem:[#allocation8 + $0x2b8] ss:$12 sps:$4 sm:$0xff]  }
  0x85   :  { %811 = vmatprep.subr.bf16.mxu1 %v2197_v33  ;;  %v2281_v33 = vld [vmem:[#allocation8 + $0xdc] ss:$12 sps:$4 sm:$0xff]  }
  0x87   :  { %847 = vmatpush1.bf16.msra.mxu0 %v2198_v36  ;;  %v2279_v36 = vld [vmem:[#allocation8 + $0xd8] ss:$12 sps:$4 sm:$0xff]  }
  0x88   :  { %812 = vmatpush2.bf16.msra.mxu1 %v2195_v35  ;;  %848 = vmatprep.subr.bf16.mxu0 %v2206_v39  ;;  %v2303_v35 = vld [vmem:[#allocation8 + $0x2bc] ss:$12 sps:$4 sm:$0xff]   ;;  %v2306_v39 = vld [vmem:[#allocation8 + $0x2a0] ss:$12 sps:$4 sm:$0xff]  }
  0x89   :  { %813 = vmatprep.subr.bf16.mxu1 %v2203_v38  ;;  %v2287_v38 = vld [vmem:[#allocation8 + $0xc4] ss:$12 sps:$4 sm:$0xff]  }
  0x8b   :  { %849 = vmatpush1.bf16.msra.mxu0 %v2204_v41  ;;  %v2285_v41 = vld [vmem:[#allocation8 + $0xc0] ss:$12 sps:$4 sm:$0xff]  }
  0x8c   :  { %814 = vmatpush2.bf16.msra.mxu1 %v2201_v40  ;;  %850 = vmatprep.subr.bf16.mxu0 %v2212_v43  ;;  %v2308_v40 = vld [vmem:[#allocation8 + $0x2a4] ss:$12 sps:$4 sm:$0xff]   ;;  %v2311_v43 = vld [vmem:[#allocation8 + $0x288] ss:$12 sps:$4 sm:$0xff]  }
  0x8d   :  { %815 = vmatprep.subr.bf16.mxu1 %v2209_v42  ;;  %v2294_v42 = vld [vmem:[#allocation8 + $0x170] ss:$12 sps:$4 sm:$0xff]  }
  0x8f   :  { %851 = vmatpush1.bf16.msra.mxu0 %v2210_v45  ;;  %v2318_v45 = vld [vmem:[#allocation8 + $0x274] ss:$12 sps:$4 sm:$0xff]  }
  0x90   :  { %816 = vmatpush2.bf16.msra.mxu1 %v2207_v44  ;;  %852 = vmatprep.subr.bf16.mxu0 %v2218_v47  ;;  %v2313_v44 = vld [vmem:[#allocation8 + $0x28c] ss:$12 sps:$4 sm:$0xff]   ;;  %v2323_v47 = vld [vmem:[#allocation8 + $0x25c] ss:$12 sps:$4 sm:$0xff]  }
  0x91   :  { %817 = vmatprep.subr.bf16.mxu1 %v2215_v46  ;;  %v2316_v46 = vld [vmem:[#allocation8 + $0x270] ss:$12 sps:$4 sm:$0xff]  }
  0x93   :  { %853 = vmatpush1.bf16.msra.mxu0 %v2216_v49  ;;  %v2328_v49 = vld [vmem:[#allocation8 + $0x244] ss:$12 sps:$4 sm:$0xff]  }
  0x94   :  { %818 = vmatpush2.bf16.msra.mxu1 %v2213_v48  ;;  %1549 = vmatprep.subr.bf16.mxu0 %v2221_v50  ;;  %v2321_v48 = vld [vmem:[#allocation8 + $0x258] ss:$12 sps:$4 sm:$0xff]   ;;  %v2326_v50 = vld [vmem:[#allocation8 + $0x240] ss:$12 sps:$4 sm:$0xff]  }
  0x95   :  { %1600 = vmatprep.subr.bf16.mxu1 %v2248_v58 }
  0x96   :  { %871 = vmatmul.mubr.bf16.vlgmr.msra.gmra.mxu0 %v2514_v37  ;;  %v2228_v37 = vld [vmem:[#allocation8 + $0x60] ss:$12 sps:$4 sm:$0xff]  }
  0x97   :  { %820 = vmatmul.mubr.bf16.vlgmr.msra.gmra.mxu1 %v2521_v15  ;;  %880 = vmatprep.mubr.bf16.mxu0 %v2471_v0  ;;  %v2233_v0 = vld [vmem:[#allocation8 + $0x4c] ss:$12 sps:$4 sm:$0xff]   ;;  %v2249_v15 = vld [vmem:[#allocation8 + $0x150] ss:$12 sps:$4 sm:$0xff]  }
  0x98   :  { %829 = vmatprep.mubr.bf16.mxu1 %v2523_v21  ;;  %1550 = vmatpush1.bf16.msra.mxu0 %v2219_v51  ;;  %v2263_v21 = vld [vmem:[#allocation8 + $0x124] ss:$12 sps:$4 sm:$0xff]  }
  0x99   :  { %1551 = vmatprep.subr.bf16.mxu0 %v2224_v52  ;;  %1601 = vmatpush1.bf16.msra.mxu1 %v2246_v57  ;;  %v2331_v51 = vld [vmem:[#allocation8 + $0x2f0] ss:$12 sps:$4 sm:$0xff]  }
  0x9a   :  { %1602 = vmatprep.subr.bf16.mxu1 %v2254_v59 }
  0x9c   :  { %1552 = vmatpush1.bf16.msra.mxu0 %v2222_v53 }
  0x9d   :  { %1553 = vmatprep.subr.bf16.mxu0 %v2227_v54  ;;  %1603 = vmatpush1.bf16.msra.mxu1 %v2252_v60 }
  0x9e   :  { %881 = vmatmul.mubr.bf16.gmra.mxu0 %v2518_v7  ;;  %1604 = vmatprep.subr.bf16.mxu1 %v2260_v61  ;;  %v2237_v7 = vld [vmem:[#allocation8 + $0x18] ss:$12 sps:$4 sm:$0xff]   ;;  %v183_v61 = vld [vmem:[#allocation7] sm:$0xf] }
  0x9f   :  { %830 = vmatmul.mubr.bf16.gmra.mxu1 %v2527_v27  ;;  %v2267_v27 = vld [vmem:[#allocation8 + $0x108] ss:$12 sps:$4 sm:$0xff]  }
  0xa0   :  { %1554 = vmatpush1.bf16.msra.mxu0 %v2225_v55  ;;  %v185_v55 = vlaneseq }
  0xa1   :  { %1555 = vmatprep.subr.bf16.mxu0 %v2230_v56  ;;  %1605 = vmatpush1.bf16.msra.mxu1 %v2258_v1 }
  0xa2   :  { %1606 = vmatprep.subr.bf16.mxu1 %v2266_v3  ;;  %v2537_v57 = vshrl.u32 %v185_v55, 7 }
  0xa4   :  { %1556 = vmatpush1.bf16.msra.mxu0 %v2228_v37  ;;  %v191_v37 = vsub.s32 1, %v2537_v57 }
  0xa5   :  { %1557 = vmatprep.subr.bf16.mxu0 %v2233_v0  ;;  %1607 = vmatpush1.bf16.msra.mxu1 %v2264_v5  ;;  %v187_v0 = vsub.s32 0, %v2537_v57 }
  0xa6   :  { %1608 = vmatprep.subr.bf16.mxu1 %v2272_v6 }
  0xa7   :  { %v188_v1 = vrot.slane %v183_v61, %v187_v0  ;;  %v2329_v0 = vld [vmem:[#allocation8 + $0xc8] ss:$12 sps:$4 sm:$0xff]  }
  0xa8   :  { %1558 = vmatpush1.bf16.msra.mxu0 %v2231_v62 }
  0xa9   :  { %1559 = vmatprep.subr.bf16.mxu0 %v2236_v63  ;;  %1609 = vmatpush1.bf16.msra.mxu1 %v2270_v9  ;;  %v192_v63 = vrot.slane %v183_v61, %v191_v37 }
  0xaa   :  { %1610 = vmatprep.subr.bf16.mxu1 %v2278_v14 }
  0xac   :  { %1560 = vmatpush1.bf16.msra.mxu0 %v2234_v2 }
  0xad   :  { %1561 = vmatprep.subr.bf16.mxu0 %v2239_v4  ;;  %1611 = vmatpush1.bf16.msra.mxu1 %v2276_v16 }
  0xae   :  { %1612 = vmatprep.subr.bf16.mxu1 %v2284_v18 }
  0xb0   :  { %1562 = vmatpush1.bf16.msra.mxu0 %v2237_v7 }
  0xb1   :  { %1563 = vmatprep.subr.bf16.mxu0 %v2242_v8  ;;  %1613 = vmatpush1.bf16.msra.mxu1 %v2282_v20 }
  0xb2   :  { %1614 = vmatprep.subr.bf16.mxu1 %v2290_v22 }
  0xb4   :  { %1564 = vmatpush1.bf16.msra.mxu0 %v2240_v10 }
  0xb5   :  { %1565 = vmatprep.subr.bf16.mxu0 %v2245_v11  ;;  %1615 = vmatpush1.bf16.msra.mxu1 %v2288_v24 }
  0xb6   :  { %1616 = vmatprep.subr.bf16.mxu1 %v2293_v26  ;;  %v2295_v26 = vld [vmem:[#allocation8 + $0xb0] ss:$12 sps:$4 sm:$0xff]  }
  0xb8   :  { %1566 = vmatpush2.bf16.msra.mxu0 %v2243_v12 }
  0xb9   :  { %1567 = vmatprep.subr.bf16.mxu0 %v2251_v13  ;;  %1617 = vmatpush2.bf16.msra.mxu1 %v2291_v28  ;;  %v2299_v28 = vld [vmem:[#allocation8 + $0x158] ss:$12 sps:$4 sm:$0xff]  }
  0xba   :  { %1618 = vmatprep.subr.bf16.mxu1 %v2298_v31 }
  0xbc   :  { %1568 = vmatpush2.bf16.msra.mxu0 %v2249_v15 }
  0xbd   :  { %1569 = vmatprep.subr.bf16.mxu0 %v2257_v17  ;;  %1619 = vmatpush2.bf16.msra.mxu1 %v2296_v30 }
  0xbe   :  { %1620 = vmatprep.subr.bf16.mxu1 %v2303_v35 }
  0xc0   :  { %1570 = vmatpush2.bf16.msra.mxu0 %v2255_v19 }
  0xc1   :  { %1571 = vmatprep.subr.bf16.mxu0 %v2263_v21  ;;  %1621 = vmatpush2.bf16.msra.mxu1 %v2301_v34  ;;  %v2304_v34 = vld [vmem:[#allocation8 + $0x140] ss:$12 sps:$4 sm:$0xff]  }
  0xc2   :  { %1622 = vmatprep.subr.bf16.mxu1 %v2308_v40  ;;  %v2314_v40 = vld [vmem:[#allocation8 + $0x110] ss:$12 sps:$4 sm:$0xff]  }
  0xc4   :  { %1572 = vmatpush2.bf16.msra.mxu0 %v2261_v23 }
  0xc5   :  { %1573 = vmatprep.subr.bf16.mxu0 %v2269_v25  ;;  %1623 = vmatpush2.bf16.msra.mxu1 %v2306_v39  ;;  %v2310_v39 = vld [vmem:[#allocation8 + $0x68] ss:$12 sps:$4 sm:$0xff]  }
  0xc6   :  { %1624 = vmatprep.subr.bf16.mxu1 %v2313_v44  ;;  %v2319_v44 = vld [vmem:[#allocation8 + $0xf8] ss:$12 sps:$4 sm:$0xff]  }
  0xc8   :  { %1574 = vmatpush2.bf16.msra.mxu0 %v2267_v27 }
  0xc9   :  { %1575 = vmatprep.subr.bf16.mxu0 %v2275_v29  ;;  %1625 = vmatpush2.bf16.msra.mxu1 %v2311_v43  ;;  %v2315_v43 = vld [vmem:[#allocation8 + $0x50] ss:$12 sps:$4 sm:$0xff]  }
  0xca   :  { %1626 = vmatprep.subr.bf16.mxu1 %v2318_v45 }
  0xcc   :  { %1576 = vmatpush2.bf16.msra.mxu0 %v2273_v32 }
  0xcd   :  { %1577 = vmatprep.subr.bf16.mxu0 %v2281_v33  ;;  %1627 = vmatpush2.bf16.msra.mxu1 %v2316_v46  ;;  %v2300_v33 = vld [vmem:[#allocation8 + $0x98] ss:$12 sps:$4 sm:$0xff]  }
  0xce   :  { %1628 = vmatprep.subr.bf16.mxu1 %v2323_v47 }
  0xd0   :  { %1578 = vmatpush2.bf16.msra.mxu0 %v2279_v36  ;;  %v2305_v36 = vld [vmem:[#allocation8 + $0x80] ss:$12 sps:$4 sm:$0xff]  }
  0xd1   :  { %1579 = vmatprep.subr.bf16.mxu0 %v2287_v38  ;;  %1629 = vmatpush2.bf16.msra.mxu1 %v2321_v48  ;;  %v2309_v38 = vld [vmem:[#allocation8 + $0x128] ss:$12 sps:$4 sm:$0xff]  }
  0xd2   :  { %1630 = vmatprep.subr.bf16.mxu1 %v2328_v49  ;;  %v2320_v49 = vld [vmem:[#allocation8 + $0x38] ss:$12 sps:$4 sm:$0xff]  }
  0xd4   :  { %1580 = vmatpush2.bf16.msra.mxu0 %v2285_v41  ;;  %v199_v41 = vsub.s32 3, %v2537_v57 }
  0xd5   :  { %2007 = vmatprep.subr.bf16.mxu0 %v2294_v42  ;;  %1631 = vmatpush2.bf16.msra.mxu1 %v2326_v50  ;;  %v195_v42 = vsub.s32 2, %v2537_v57  ;;  %v2325_v57 = vld [vmem:[#allocation8 + $0x20] ss:$12 sps:$4 sm:$0xff]  }
  0xd6   :  { %2035 = vmatprep.subr.bf16.mxu1 %v2331_v51  ;;  %v200_v45 = vrot.slane %v183_v61, %v199_v41 }
  0xd7   :  { %v196_v46 = vrot.slane %v183_v61, %v195_v42 }
 0x117   :  { %v770_v52 = vpop.f32.mrf.mxu1 }
 0x119   :  { %v772_v53 = vpop.f32.mrf.mxu1 }
 0x11b   :  { %v774_v54 = vpop.f32.mrf.mxu1 }
 0x11d   :  { %v776_v56 = vpop.f32.mrf.mxu1 }
 0x11f   :  { %v780_v58 = vpop.f32.mrf.mxu1 }
 0x121   :  { %v782_v59 = vpop.f32.mrf.mxu1 }
 0x123   :  { %v784_v60 = vpop.f32.mrf.mxu1 }
 0x125   :  { %v785_v62 = vpop.f32.mrf.mxu1 }
 0x136   :  { %v719_v2 = vpop.f32.mrf.mxu0 }
 0x137   :  { %v720_v5 = vadd.f32 %v719_v2, %v188_v1 }
 0x138   :  { %v721_v3 = vpop.f32.mrf.mxu0 }
 0x139   :  { %v722_v4 = vadd.f32 %v721_v3, %v192_v63  ;;  %v771_v12 = vadd.f32 %v770_v52, %v720_v5  ;;  %v2324_v52 = vld [vmem:[#allocation8 + $0xe0] ss:$12 sps:$4 sm:$0xff]   ;;  %v2330_v5 = vld [vmem:[#allocation8 + $0x8] ss:$12 sps:$4 sm:$0xff]  }
 0x13a   :  { %v723_v6 = vpop.f32.mrf.mxu0 }
 0x13b   :  { %v724_v7 = vadd.f32 %v723_v6, %v188_v1  ;;  %v773_v9 = vadd.f32 %v772_v53, %v722_v4  ;;  %v889_v21 = vmax.f32 %v771_v12, 0.0 }
 0x13c   :  { %v725_v8 = vpop.f32.mrf.mxu0 }
 0x13d   :  { %v775_v10 = vadd.f32 %v774_v54, %v724_v7  ;;  %v726_v11 = vadd.f32 %v725_v8, %v192_v63  ;;  %v890_v18 = vmax.f32 %v773_v9, 0.0 }
 0x13e   :  { %v729_v13 = vpop.f32.mrf.mxu0 }
 0x13f   :  { %v777_v14 = vadd.f32 %v776_v56, %v726_v11  ;;  %v730_v15 = vadd.f32 %v729_v13, %v188_v1  ;;  %v893_v16 = vmax.f32 %v775_v10, 0.0 }
 0x140   :  { %v731_v17 = vpop.f32.mrf.mxu0 }
 0x141   :  { %v894_v19 = vmax.f32 %v777_v14, 0.0  ;;  %v732_v20 = vadd.f32 %v731_v17, %v192_v63  ;;  %v781_v22 = vadd.f32 %v780_v58, %v730_v15  ;;  %v2541_v27 = vpack.c.bf16 %v893_v16, %v889_v21 }
 0x142   :  { %v733_v23 = vpop.f32.mrf.mxu0 }
 0x143   :  { %v902_v24 = vpack.c.bf16 %v894_v19, %v890_v18  ;;  %v783_v25 = vadd.f32 %v782_v59, %v732_v20  ;;  %v897_v31 = vmax.f32 %v781_v22, 0.0  ;;  %v2332_v18 = vld [vmem:[#allocation8 + $0x230] ss:$12 sps:$4 sm:$0xff]   ;;  %v2333_v20 = vld [vmem:[#allocation8 + $0x2d8] ss:$12 sps:$4 sm:$0xff]  }
 0x144   :  { %v734_v29 = vpop.f32.mrf.mxu0 }
 0x145   :  { %1581 = vmatprep.mubr.bf16.mxu0 %v902_v24  ;;  %v898_v30 = vmax.f32 %v783_v25, 0.0  ;;  %v2547_v35 = vpack.c.bf16 %v897_v31, %v897_v31  ;;  %v2337_v31 = vld [vmem:[#allocation8 + $0x2a8] ss:$12 sps:$4 sm:$0xff]  }
 0x146   :  { %1582 = vmatmul.mubr.bf16.vlgmr.msra.gmra.mxu0 %v2541_v27 }
 0x147   :  { %v2544_v32 = vpack.c.bf16 %v898_v30, %v898_v30  ;;  %2008 = vmatpush3.bf16.msra.mxu0 %v2295_v26  ;;  %v2334_v26 = vld [vmem:[#allocation8 + $0x218] ss:$12 sps:$4 sm:$0xff]   ;;  %v2336_v30 = vld [vmem:[#allocation8 + $0x200] ss:$12 sps:$4 sm:$0xff]  }
 0x148   :  { %2009 = vmatprep.subr.bf16.mxu0 %v2299_v28  ;;  %v2335_v28 = vld [vmem:[#allocation8 + $0x2c0] ss:$12 sps:$4 sm:$0xff]  }
 0x149   :  { %1591 = vmatprep.mubr.bf16.mxu0 %v2544_v32 }
 0x14b   :  { %2010 = vmatpush3.bf16.msra.mxu0 %v2300_v33  ;;  %v2339_v33 = vld [vmem:[#allocation8 + $0x290] ss:$12 sps:$4 sm:$0xff]  }
 0x14c   :  { %2011 = vmatprep.subr.bf16.mxu0 %v2304_v34  ;;  %v2341_v34 = vld [vmem:[#allocation8 + $0x278] ss:$12 sps:$4 sm:$0xff]  }
 0x14e   :  { %1592 = vmatmul.mubr.bf16.gmra.mxu0 %v2547_v35 }
 0x14f   :  { %2012 = vmatpush3.bf16.msra.mxu0 %v2305_v36  ;;  %1683 = vmatprep.mubr.bf16.mxu0 %v902_v24  ;;  %v2342_v36 = vld [vmem:[#allocation8 + $0x1b8] ss:$12 sps:$4 sm:$0xff]  }
 0x150   :  { %2013 = vmatprep.subr.bf16.mxu0 %v2309_v38  ;;  %v2343_v38 = vld [vmem:[#allocation8 + $0x260] ss:$12 sps:$4 sm:$0xff]  }
 0x153   :  { %2014 = vmatpush3.bf16.msra.mxu0 %v2310_v39  ;;  %v2344_v39 = vld [vmem:[#allocation8 + $0x1a0] ss:$12 sps:$4 sm:$0xff]  }
 0x154   :  { %2015 = vmatprep.subr.bf16.mxu0 %v2314_v40  ;;  %v2345_v40 = vld [vmem:[#allocation8 + $0x248] ss:$12 sps:$4 sm:$0xff]  }
 0x156   :  { %v872_v48 = vpop.f32.mrf.mxu0 }
 0x157   :  { %v821_v47 = vpop.f32.mrf.mxu1  ;;  %2016 = vmatpush3.bf16.msra.mxu0 %v2315_v43 }
 0x158   :  { %v874_v51 = vpop.f32.mrf.mxu0  ;;  %2017 = vmatprep.subr.bf16.mxu0 %v2319_v44  ;;  %v822_v54 = vadd.f32 %v821_v47, %v196_v46 }
 0x159   :  { %v823_v50 = vpop.f32.mrf.mxu1 }
 0x15a   :  { %v824_v53 = vadd.f32 %v823_v50, %v200_v45  ;;  %v876_v56 = vpop.f32.mrf.mxu0  ;;  %v873_v63 = vadd.f32 %v872_v48, %v822_v54 }
 0x15b   :  { %v825_v55 = vpop.f32.mrf.mxu1  ;;  %2018 = vmatpush3.bf16.msra.mxu0 %v2320_v49 }
 0x15c   :  { %v826_v58 = vadd.f32 %v825_v55, %v196_v46  ;;  %v878_v37 = vpop.f32.mrf.mxu0  ;;  %2019 = vmatprep.subr.bf16.mxu0 %v2324_v52  ;;  %v875_v60 = vadd.f32 %v874_v51, %v824_v53  ;;  %v891_v12 = vmax.f32 %v873_v63, 0.0 }
 0x15d   :  { %v827_v59 = vpop.f32.mrf.mxu1 }
 0x15e   :  { %v877_v61 = vadd.f32 %v876_v56, %v826_v58  ;;  %v828_v62 = vadd.f32 %v827_v59, %v200_v45  ;;  %v882_v2 = vpop.f32.mrf.mxu0  ;;  %v892_v9 = vmax.f32 %v875_v60, 0.0 }
 0x15f   :  { %v831_v1 = vpop.f32.mrf.mxu1  ;;  %2020 = vmatpush3.bf16.msra.mxu0 %v2325_v57 }
 0x160   :  { %v879_v3 = vadd.f32 %v878_v37, %v828_v62  ;;  %v832_v4 = vadd.f32 %v831_v1, %v196_v46  ;;  %v895_v6 = vmax.f32 %v877_v61, 0.0  ;;  %2021 = vmatprep.subr.bf16.mxu0 %v2329_v0  ;;  %v884_v8 = vpop.f32.mrf.mxu0 }
 0x161   :  { %v833_v7 = vpop.f32.mrf.mxu1 }
 0x162   :  { %v896_v10 = vmax.f32 %v879_v3, 0.0  ;;  %v834_v11 = vadd.f32 %v833_v7, %v200_v45  ;;  %v883_v13 = vadd.f32 %v882_v2, %v832_v4  ;;  %v886_v15 = vpop.f32.mrf.mxu0  ;;  %v903_v19 = vpack.c.bf16 %v895_v6, %v891_v12 }
 0x163   :  { %v835_v14 = vpop.f32.mrf.mxu1  ;;  %2022 = vmatpush3.bf16.msra.mxu0 %v2330_v5 }
 0x164   :  { %v904_v16 = vpack.c.bf16 %v896_v10, %v892_v9  ;;  %v885_v17 = vadd.f32 %v884_v8, %v834_v11  ;;  %v887_v22 = vpop.f32.mrf.mxu0  ;;  %v899_v24 = vmax.f32 %v883_v13, 0.0 }
 0x165   :  { %v836_v21 = vpop.f32.mrf.mxu1 }
 0x166   :  { %1632 = vmatprep.mubr.bf16.mxu1 %v904_v16  ;;  %v900_v23 = vmax.f32 %v885_v17, 0.0  ;;  %1684 = vmatmul.mubr.bf16.vlgmr.msra.gmra.mxu0 %v2541_v27  ;;  %v907_v29 = vpack.c.bf16 %v899_v24, %v899_v24  ;;  %v2338_v27 = vld [vmem:[#allocation8 + $0x1e8] ss:$12 sps:$4 sm:$0xff]  }
 0x167   :  { %1633 = vmatmul.mubr.bf16.vlgmr.msra.gmra.mxu1 %v903_v19  ;;  %1691 = vmatprep.mubr.bf16.mxu0 %v2544_v32  ;;  %v2340_v32 = vld [vmem:[#allocation8 + $0x1d0] ss:$12 sps:$4 sm:$0xff]  }
 0x168   :  { %v908_v25 = vpack.c.bf16 %v900_v23, %v900_v23  ;;  %2036 = vmatpush3.bf16.msra.mxu1 %v2332_v18 }
 0x169   :  { %2037 = vmatprep.subr.bf16.mxu1 %v2333_v20 }
 0x16a   :  { %1642 = vmatprep.mubr.bf16.mxu1 %v908_v25 }
 0x16c   :  { %2038 = vmatpush3.bf16.msra.mxu1 %v2334_v26 }
 0x16d   :  { %2039 = vmatprep.subr.bf16.mxu1 %v2335_v28 }
 0x16e   :  { %1692 = vmatmul.mubr.bf16.gmra.mxu0 %v2547_v35  ;;  %v2346_v35 = vld [vmem:[#allocation8 + $0x188] ss:$12 sps:$4 sm:$0xff]  }
 0x16f   :  { %1643 = vmatmul.mubr.bf16.gmra.mxu1 %v907_v29 }
 0x170   :  { %2040 = vmatpush3.bf16.msra.mxu1 %v2336_v30  ;;  %1731 = vmatprep.mubr.bf16.mxu1 %v904_v16 }
 0x171   :  { %2041 = vmatprep.subr.bf16.mxu1 %v2337_v31 }
 0x174   :  { %2042 = vmatpush3.bf16.msra.mxu1 %v2338_v27 }
 0x175   :  { %2043 = vmatprep.subr.bf16.mxu1 %v2339_v33 }
 0x178   :  { %2044 = vmatpush3.bf16.msra.mxu1 %v2340_v32 }
 0x179   :  { %2045 = vmatprep.subr.bf16.mxu1 %v2341_v34 }
 0x17c   :  { %2046 = vmatpush3.bf16.msra.mxu1 %v2342_v36 }
 0x17d   :  { %2047 = vmatprep.subr.bf16.mxu1 %v2343_v38 }
 0x180   :  { %2048 = vmatpush3.bf16.msra.mxu1 %v2344_v39 }
 0x181   :  { %2049 = vmatprep.subr.bf16.mxu1 %v2345_v40 }
 0x184   :  { %2050 = vmatpush3.bf16.msra.mxu1 %v2346_v35 }
 0x187   :  { %1732 = vmatmul.mubr.bf16.vlgmr.msra.gmra.mxu1 %v903_v19 }
 0x188   :  { %1739 = vmatprep.mubr.bf16.mxu1 %v908_v25 }
 0x18f   :  { %1740 = vmatmul.mubr.bf16.gmra.mxu1 %v907_v29 }
 0x206   :  { %v1583_v41 = vpop.f32.mrf.mxu0 }
 0x208   :  { %v1585_v42 = vpop.f32.mrf.mxu0 }
 0x20a   :  { %v1587_v43 = vpop.f32.mrf.mxu0 }
 0x20c   :  { %v1589_v44 = vpop.f32.mrf.mxu0 }
 0x20e   :  { %v1593_v45 = vpop.f32.mrf.mxu0 }
 0x210   :  { %v1595_v46 = vpop.f32.mrf.mxu0 }
 0x212   :  { %v1597_v47 = vpop.f32.mrf.mxu0 }
 0x214   :  { %v1598_v48 = vpop.f32.mrf.mxu0 }
 0x226   :  { %v2023_v49 = vpop.f32.mrf.mxu0 }
 0x227   :  { %v1634_v50 = vpop.f32.mrf.mxu1 }
 0x228   :  { %v2024_v51 = vpop.f32.mrf.mxu0  ;;  %v1635_v2 = vadd.f32 %v1634_v50, %v1583_v41 }
 0x229   :  { %v1636_v52 = vpop.f32.mrf.mxu1  ;;  %v2025_v4 = vadd.f32 %v2024_v51, %v2023_v49 }
 0x22a   :  { %v2026_v53 = vpop.f32.mrf.mxu0  ;;  %v1637_v63 = vadd.f32 %v1636_v52, %v1585_v42  ;;  %v1747_v9 = vmul.f32 %v1635_v2, %v1635_v2 }
 0x22b   :  { %v1638_v54 = vpop.f32.mrf.mxu1 }
 0x22c   :  { %v2027_v55 = vpop.f32.mrf.mxu0  ;;  %v1748_v5 = vmul.f32 %v1637_v63, %v1637_v63  ;;  %v1639_v10 = vadd.f32 %v1638_v54, %v1587_v43 }
 0x22d   :  { %v1640_v56 = vpop.f32.mrf.mxu1  ;;  %v2028_v13 = vadd.f32 %v2027_v55, %v2026_v53 }
 0x22e   :  { %v2029_v58 = vpop.f32.mrf.mxu0  ;;  %v1641_v6 = vadd.f32 %v1640_v56, %v1589_v44  ;;  %v1756_v19 = vadd.f32 %v1748_v5, %v1747_v9  ;;  %v1750_v21 = vmul.f32 %v1639_v10, %v1639_v10 }
 0x22f   :  { %v1644_v57 = vpop.f32.mrf.mxu1 }
 0x230   :  { %v2030_v59 = vpop.f32.mrf.mxu0  ;;  %v1645_v14 = vadd.f32 %v1644_v57, %v1593_v45  ;;  %v1751_v16 = vmul.f32 %v1641_v6, %v1641_v6 }
 0x231   :  { %v1646_v37 = vpop.f32.mrf.mxu1  ;;  %v2031_v28 = vadd.f32 %v2030_v59, %v2029_v58 }
 0x232   :  { %v2032_v0 = vpop.f32.mrf.mxu0  ;;  %v1647_v11 = vadd.f32 %v1646_v37, %v1595_v46  ;;  %v1753_v25 = vmul.f32 %v1645_v14, %v1645_v14  ;;  %v1760_v31 = vadd.f32 %v1751_v16, %v1750_v21 }
 0x233   :  { %v1648_v60 = vpop.f32.mrf.mxu1 }
 0x234   :  { %v2033_v61 = vpop.f32.mrf.mxu0  ;;  %v1754_v22 = vmul.f32 %v1647_v11, %v1647_v11  ;;  %v1765_v39 = vsel %vm1764_vm0, %v1753_v25, 0.0 }
 0x235   :  { %v1649_v62 = vpop.f32.mrf.mxu1 }
 0x236   :  { %v1766_v34 = vsel %vm1764_vm0, %v1754_v22, 0.0 }
 0x237   :  { %v1767_v40 = vadd.f32 %v1766_v34, %v1765_v39 }
 0x247   :  { %v2051_v1 = vpop.f32.mrf.mxu1 }
 0x249   :  { %v2052_v3 = vpop.f32.mrf.mxu1 }
 0x24a   :  { %v2053_v7 = vadd.f32 %v2052_v3, %v2051_v1 }
 0x24b   :  { %v2054_v8 = vpop.f32.mrf.mxu1 }
 0x24c   :  { %v1734_v12 = vadd.f32 %v2053_v7, %v2025_v4 }
 0x24d   :  { %v2055_v15 = vpop.f32.mrf.mxu1 }
 0x24e   :  { %v2056_v17 = vadd.f32 %v2055_v15, %v2054_v8  ;;  %v1749_v18 = vmul.f32 %v1734_v12, %v1734_v12 }
 0x24f   :  { %v2057_v20 = vpop.f32.mrf.mxu1 }
 0x250   :  { %v1737_v23 = vadd.f32 %v2056_v17, %v2028_v13  ;;  %v1757_v24 = vadd.f32 %v1756_v19, %v1749_v18 }
 0x251   :  { %v2058_v26 = vpop.f32.mrf.mxu1 }
 0x252   :  { %v2059_v29 = vadd.f32 %v2058_v26, %v2057_v20  ;;  %1758 = vadd.xlane.f32.xlu0 %v1757_v24  ;;  %v1752_v30 = vmul.f32 %v1737_v23, %v1737_v23 }
 0x253   :  { %v2060_v27 = vpop.f32.mrf.mxu1 }
 0x254   :  { %v1742_v33 = vadd.f32 %v2059_v29, %v2031_v28  ;;  %v1761_v32 = vadd.f32 %v1760_v31, %v1752_v30 }
 0x255   :  { %v2061_v36 = vpop.f32.mrf.mxu1 }
 0x256   :  { %1762 = vadd.xlane.f32.xlu0 %v1761_v32  ;;  %v1755_v38 = vmul.f32 %v1742_v33, %v1742_v33 }
 0x258   :  { %v1768_v35 = vsel %vm1764_vm0, %v1755_v38, 0.0 }
 0x259   :  { %v1769_v41 = vadd.f32 %v1768_v35, %v1767_v40 }
 0x25b   :  { %1770 = vadd.xlane.f32.xlu1 %v1769_v41 }
 0x2db   :  { %v1759_v42 = vpop.xlane.xlu0 %1758 }
 0x2dc   :  { %v1772_v43 = vmax.f32 %v1759_v42, 1e-24 }
 0x2de   :  { %2347 = vrsqrt.f32 %v1772_v43 }
 0x2df   :  { %v1763_v44 = vpop.xlane.xlu0 %1762 }
 0x2e0   :  { %v1773_v45 = vmax.f32 %v1763_v44, 1e-24 }
 0x2e2   :  { %2349 = vrsqrt.f32 %v1773_v45 }
 0x2e4   :  { %v1771_v46 = vpop.xlane.xlu1 %1770 }
 0x2e5   :  { %v1774_v47 = vmax.f32 %v1771_v46, 1e-24 }
 0x2e7   :  { %2351 = vrsqrt.f32 %v1774_v47 }
 0x2eb   :  { %v2348_v48 = vpop.eup %2347 }
 0x2ec   :  { %v1778_v49 = vmul.f32 %v2348_v48, %v1635_v2  ;;  %v1779_v50 = vmul.f32 %v2348_v48, %v1637_v63  ;;  %v1780_v51 = vmul.f32 %v2348_v48, %v1734_v12 }
 0x2ee   :  { %1787 = vst [vmem:[#allocation10] sm:$0xff] %v1778_v49  ;;  %1788 = vst [vmem:[#allocation10 + $0x8] sm:$0xff] %v1779_v50 }
 0x2ef   :  { %1789 = vst [vmem:[#allocation10 + $0x10] sm:$0xff] %v1780_v51  ;;  %v2350_v52 = vpop.eup %2349 }
 0x2f0   :  { %v1781_v53 = vmul.f32 %v2350_v52, %v1639_v10  ;;  %v1782_v54 = vmul.f32 %v2350_v52, %v1641_v6  ;;  %v1783_v55 = vmul.f32 %v2350_v52, %v1737_v23 }
 0x2f2   :  { %1790 = vst [vmem:[#allocation10 + $0x18] sm:$0xff] %v1781_v53  ;;  %1791 = vst [vmem:[#allocation10 + $0x20] sm:$0xff] %v1782_v54 }
 0x2f3   :  { %1792 = vst [vmem:[#allocation10 + $0x28] sm:$0xff] %v1783_v55 }
 0x2f4   :  { %v2352_v56 = vpop.eup %2351 }
 0x2f5   :  { %v1784_v58 = vmul.f32 %v2352_v56, %v1645_v14  ;;  %v1785_v57 = vmul.f32 %v2352_v56, %v1647_v11  ;;  %v1786_v59 = vmul.f32 %v2352_v56, %v1742_v33 }
 0x2f7   :  { %1793 = vst [vmem:[#allocation10 + $0x30] sm:$0xf] %v1784_v58  ;;  %1794 = vst [vmem:[#allocation10 + $0x38] sm:$0xf] %v1785_v57 }
 0x2f8   :  { %1795 = vst [vmem:[#allocation10 + $0x40] sm:$0xf] %v1786_v59 }
 0x2f9   :  { %2444 = shalt.err (!%p2441_p10)
}
 0x2fa   :  { %1807 = dma.vmem_to_hbm [thread:$0]  %s1802_s3, 1152, %s2565_s4, [#allocation4], %s2465_s25, %s2465_s25, %s2466_s26  }
 0x2fb   :  { %2459 = dma.done.wait [#allocation4], 1152  }
 0x2fc   :  { %2460 = vsyncadd [#allocation4], 4294966144 }
 0x2fd   :  { %1811 = vsyncpa [#allocation3], 1 }
 0x2fe   :  { %1812 = vsyncpa [#allocation6], 1 }
 0x2ff   :  { %1813 = vsyncpa [#allocation9], 1 }
 0x300   :  { %1814 = vsyncpa [#allocation4], 1 }

</bundles_post_ra>
